<compile_context>
chip_gen: v7x
topology: tpu7x:2x2x1
jax: 0.10.0
libtpu: 0.0.40
codegen_flags: <defaults>
</compile_context>

<pallas_src>
import functools

import jax
import jax.numpy as jnp
from jax.experimental import pallas as pl
from jax.experimental.pallas import tpu as pltpu


# ---------------------------------------------------------------------------
# Host-side probes (run eagerly, outside any jit; cached).
# ---------------------------------------------------------------------------
_VMEM_CAP = None
_BUFFERED_ONE_OK = None


def _vmem_capacity_bytes():
    global _VMEM_CAP
    if _VMEM_CAP is None:
        cap = 64 * 1024 * 1024  # conservative v7x-sized fallback
        try:
            info = pltpu.get_tpu_info()
            got = getattr(info, "vmem_capacity_bytes", None)
            if got:
                cap = int(got)
        except Exception:
            pass
        _VMEM_CAP = cap
    return _VMEM_CAP


def _probe_copy_kernel(x_ref, o_ref):
    o_ref[...] = x_ref[...]


def _supports_single_buffered_spec():
    """Probe pl.Buffered(1) on a constant-index BlockSpec.

    A single-buffered resident weight saves a redundant second weight buffer
    (matters most on 64-MiB-VMEM v7x).  Probed once with a tiny eager kernel
    so an unsupported jax/Mosaic version cleanly falls back to the default
    double buffering instead of failing the main compile.
    """
    global _BUFFERED_ONE_OK
    if _BUFFERED_ONE_OK is None:
        ok = False
        try:
            x = jnp.arange(8 * 128, dtype=jnp.float32).reshape(8, 128)
            y = pl.pallas_call(
                _probe_copy_kernel,
                out_shape=jax.ShapeDtypeStruct((8, 128), jnp.float32),
                grid=(1,),
                in_specs=[pl.BlockSpec((8, 128), lambda i: (0, 0),
                                       pipeline_mode=pl.Buffered(1))],
                out_specs=pl.BlockSpec((8, 128), lambda i: (0, 0)),
            )(x)
            jax.block_until_ready(y)
            ok = bool(jnp.all(y == x))
        except Exception:
            ok = False
        _BUFFERED_ONE_OK = ok
    return _BUFFERED_ONE_OK


def _pick_tm(m, target):
    """Row-tile size.

    Returns a multiple-of-8 divisor of m (so no padding and no ragged tiles),
    preferring >= 2 grid steps (v7x megacore sharding); falls back to a single
    full-m tile, which is always layout-legal (block dim == full array dim).
    """
    target = max(8, min(target, m))
    if m % 8 == 0:
        half = (m // 2) // 8 * 8  # cap giving at least two tiles
        caps = []
        if half >= 8:
            caps.append(min(target, half))
        caps.append(target)
        for cap in caps:
            d = (cap // 8) * 8
            while d >= 8:
                if m % d == 0:
                    return d
                d -= 8
    return m


# ---------------------------------------------------------------------------
# Kernel.
# ---------------------------------------------------------------------------
def _patch_embed_kernel(x_ref, w_ref, b_ref, o_ref):
    # x_ref: (TM, K) bf16 (streamed)   w_ref: (K, E) bf16 (resident)
    # b_ref: (1, E) f32 (resident)     o_ref: (TM, E) out dtype
    acc = jnp.dot(x_ref[...], w_ref[...], preferred_element_type=jnp.float32)
    o_ref[...] = (acc + b_ref[...]).astype(o_ref.dtype)


@functools.partial(
    jax.jit,
    static_argnames=("patch_size", "tm", "out_dtype", "single_buffer_weights",
                     "vmem_limit"))
def _patch_embed_impl(x, weight, bias, *, patch_size, tm, out_dtype,
                      single_buffer_weights, vmem_limit):
    B, C, H, W = x.shape
    E = weight.shape[0]
    ph = pw = patch_size
    gh, gw = H // ph, W // pw
    P = gh * gw
    K = C * ph * pw
    M = B * P

    # im2col for non-overlapping patches + bf16 cast, composed under jit so
    # XLA emits ONE fused HBM pass (read f32 x, write bf16 patch matrix).
    xp = (x.reshape(B, C, gh, ph, gw, pw)
            .transpose(0, 2, 4, 1, 3, 5)
            .reshape(M, K)
            .astype(jnp.bfloat16))

    # Conv2d weight (E, C, ph, pw) -> (K, E); tiny, done once per compile.
    w_t = weight.reshape(E, K).T.astype(jnp.bfloat16)
    b2 = bias.astype(jnp.float32).reshape(1, E)

    grid_m = M // tm  # tm always divides M (see _pick_tm)
    out_bytes = jnp.dtype(out_dtype).itemsize

    cost = pl.CostEstimate(
        flops=2 * M * K * E,
        transcendentals=0,
        bytes_accessed=M * K * 2 + K * E * 2 + E * 4 + M * E * out_bytes,
    )

    # Resident weight/bias: constant block index -> never re-DMA'd; request a
    # single buffer when supported (frees VMEM, mainly on v7x).
    res_mode = ({"pipeline_mode": pl.Buffered(1)}
                if single_buffer_weights else {})

    out = pl.pallas_call(
        _patch_embed_kernel,
        out_shape=jax.ShapeDtypeStruct((M, E), out_dtype),
        grid_spec=pltpu.PrefetchScalarGridSpec(
            num_scalar_prefetch=0,
            grid=(grid_m,),
            in_specs=[
                pl.BlockSpec((tm, K), lambda i: (i, 0)),            # rows
                pl.BlockSpec((K, E), lambda i: (0, 0), **res_mode),  # weight
                pl.BlockSpec((1, E), lambda i: (0, 0), **res_mode),  # bias
            ],
            out_specs=pl.BlockSpec((tm, E), lambda i: (i, 0)),
        ),
        compiler_params=pltpu.CompilerParams(
            dimension_semantics=("parallel",),  # megacore shard on v7x
            vmem_limit_bytes=vmem_limit,
        ),
        cost_estimate=cost,
    )(xp, w_t, b2)

    return out.reshape(B, P, E)


def patch_embed(x, weight, bias, patch_size, *, tm=None, out_dtype=None):
    """x: (B, C, H, W) NCHW.  weight: (E, C, ph, pw).  bias: (E,).

    Returns (B, num_patches, E) -- matches PyTorch
    proj(x).flatten(2).transpose(1, 2) with norm = Identity.
    `out_dtype` lets bf16 models avoid an f32 writeback (defaults to x.dtype).
    """
    B, C, H, W = x.shape
    E = weight.shape[0]
    ph = pw = patch_size
    assert H % ph == 0 and W % pw == 0
    gh, gw = H // ph, W // pw
    K = C * ph * pw
    M = B * gh * gw

    out_dtype = jnp.dtype(out_dtype if out_dtype is not None else x.dtype)
    out_bytes = out_dtype.itemsize

    # Per-generation VMEM budget: ~100 MiB on 128-MiB parts (v5e/v6e), a
    # headroom-aware ~52 MiB on the 64-MiB v7x part.
    vmem_cap = _vmem_capacity_bytes()
    big_vmem = vmem_cap >= 100 * 1024 * 1024
    vmem_budget = (100 if big_vmem else 52) * 1024 * 1024
    tm_target = tm if tm is not None else (2048 if big_vmem else 1024)

    # Clamp tm so double-buffered x/out tiles + resident weight/bias fit.
    weights_bytes = K * E * 2 + E * 4
    per_row = 2 * (K * 2 + E * out_bytes)  # double-buffered x + out rows
    fit_rows = (vmem_budget - weights_bytes - (4 << 20)) // max(per_row, 1)
    tm_target = max(8, min(tm_target, max(8, (fit_rows // 8) * 8)))

    tm_res = _pick_tm(M, tm_target)

    single_buffer_weights = _supports_single_buffered_spec()

    vmem_est = (2 * tm_res * (K * 2 + E * out_bytes)
                + (1 if single_buffer_weights else 2) * weights_bytes)
    vmem_limit = int(min(vmem_budget, max(vmem_est + (4 << 20), 32 << 20)))

    return _patch_embed_impl(
        x, weight, bias,
        patch_size=patch_size, tm=tm_res, out_dtype=out_dtype,
        single_buffer_weights=single_buffer_weights, vmem_limit=vmem_limit)


if __name__ == "__main__":
    # Small shapes consistent with the module: img=16, patch=4, C=4, E=32, B=2.
    B, C, H, W = 2, 4, 16, 16
    patch_size = 4
    embed_dim = 32

    key = jax.random.PRNGKey(0)
    kx, kw, kb = jax.random.split(key, 3)
    x = jax.random.normal(kx, (B, C, H, W), dtype=jnp.float32)
    # Deterministic synthetic Conv2d parameters (shapes from nn.Conv2d).
    weight = jax.random.normal(
        kw, (embed_dim, C, patch_size, patch_size), dtype=jnp.float32) * 0.02
    bias = jax.random.normal(kb, (embed_dim,), dtype=jnp.float32) * 0.02

    y = patch_embed(x, weight, bias, patch_size)
    jax.block_until_ready(y)

    # Reference with the same bf16 input quantization (f32 conv accumulate),
    # mirroring the kernel's bf16-MXU / f32-accumulate math.
    x_q = x.astype(jnp.bfloat16).astype(jnp.float32)
    w_q = weight.astype(jnp.bfloat16).astype(jnp.float32)
    ref = jax.lax.conv_general_dilated(
        x_q, w_q, window_strides=(patch_size, patch_size), padding="VALID",
        dimension_numbers=("NCHW", "OIHW", "NCHW"))
    ref = ref + bias.reshape(1, embed_dim, 1, 1)
    ref = ref.reshape(B, embed_dim, -1).transpose(0, 2, 1)

    num_patches = (H // patch_size) * (W // patch_size)
    assert y.shape == (B, num_patches, embed_dim)
    assert y.dtype == x.dtype  # default out_dtype follows the input
    assert jnp.allclose(y.astype(jnp.float32), ref, atol=1e-2, rtol=1e-2)

    print("KERNEL_OK")
</pallas_src>

<mosaic_0001>
module attributes {stable_mosaic.version = 11 : i64} {
  func.func @_probe_copy_kernel(%arg0: i32, %arg1: memref<8x128xf32, #tpu.memory_space<vmem>>, %arg2: memref<8x128xf32, #tpu.memory_space<vmem>>) attributes {dimension_semantics = [#tpu.dimension_semantics<arbitrary>], iteration_bounds = array<i64: 1>, scalar_prefetch = 0 : i64, scratch_operands = 0 : i64, tpu.core_type = #tpu.core_type<tc>, window_params = [{pipeline_mode = #tpu.pipeline_mode<synchronous>, transform_indices = @transform_0, window_bounds = array<i64: 8, 128>}, {pipeline_mode = #tpu.pipeline_mode<synchronous>, transform_indices = @transform_1, window_bounds = array<i64: 8, 128>}]} {
    %c0 = arith.constant 0 : index
    %c0_0 = arith.constant 0 : index
    %0 = vector.load %arg1[%c0, %c0_0] : memref<8x128xf32, #tpu.memory_space<vmem>>, vector<8x128xf32>
    %c0_1 = arith.constant 0 : index
    %c0_2 = arith.constant 0 : index
    %1 = vector.load %arg2[%c0_1, %c0_2] : memref<8x128xf32, #tpu.memory_space<vmem>>, vector<8x128xf32>
    tpu.vector_store %arg2[%c0_1, %c0_2], %0 {strides = array<i32>} : memref<8x128xf32, #tpu.memory_space<vmem>>, vector<8x128xf32>,
    return
  }
  func.func @transform_0(%arg0: i32) -> (i32, i32) {
    %c0_i32 = arith.constant 0 : i32
    %c0_i32_0 = arith.constant 0 : i32
    %c0_i32_1 = arith.constant 0 : i32
    return %c0_i32, %c0_i32_0 : i32, i32
  }
  func.func @transform_1(%arg0: i32) -> (i32, i32) {
    %c0_i32 = arith.constant 0 : i32
    %c0_i32_0 = arith.constant 0 : i32
    %c0_i32_1 = arith.constant 0 : i32
    return %c0_i32, %c0_i32_0 : i32, i32
  }
}

module attributes {stable_mosaic.version = 11 : i64} {
  func.func @_patch_embed_kernel(%arg0: i32, %arg1: memref<16x64xbf16, #tpu.memory_space<vmem>>, %arg2: memref<64x32xbf16, #tpu.memory_space<vmem>>, %arg3: memref<1x32xf32, #tpu.memory_space<vmem>>, %arg4: memref<16x32xf32, #tpu.memory_space<vmem>>) attributes {dimension_semantics = [#tpu.dimension_semantics<parallel>], iteration_bounds = array<i64: 2>, scalar_prefetch = 0 : i64, scratch_operands = 0 : i64, tpu.core_type = #tpu.core_type<tc>, window_params = [{transform_indices = @transform_0, window_bounds = array<i64: 16, 64>}, {pipeline_mode = #tpu.pipeline_mode<synchronous>, transform_indices = @transform_1, window_bounds = array<i64: 64, 32>}, {pipeline_mode = #tpu.pipeline_mode<synchronous>, transform_indices = @transform_2, window_bounds = array<i64: 1, 32>}, {transform_indices = @transform_3, window_bounds = array<i64: 16, 32>}]} {
    %c0 = arith.constant 0 : index
    %c0_0 = arith.constant 0 : index
    %0 = vector.load %arg1[%c0, %c0_0] : memref<16x64xbf16, #tpu.memory_space<vmem>>, vector<16x64xbf16>
    %c0_1 = arith.constant 0 : index
    %c0_2 = arith.constant 0 : index
    %1 = vector.load %arg2[%c0_1, %c0_2] : memref<64x32xbf16, #tpu.memory_space<vmem>>, vector<64x32xbf16>
    %cst = arith.constant dense<0.000000e+00> : vector<16x32xf32>
    %2 = tpu.matmul %0, %1, %cst {dimension_numbers = #tpu.dot_dimension_numbers<[1], [0], [0], [1], [0, 0, 1, 1], [], []>} : vector<16x64xbf16>, vector<64x32xbf16>, vector<16x32xf32> -> vector<16x32xf32>
    %c0_3 = arith.constant 0 : index
    %c0_4 = arith.constant 0 : index
    %3 = vector.load %arg3[%c0_3, %c0_4] : memref<1x32xf32, #tpu.memory_space<vmem>>, vector<1x32xf32>
    %4 = vector.broadcast %3 : vector<1x32xf32> to vector<16x32xf32>
    %5 = arith.addf %2, %4 : vector<16x32xf32>
    %c0_5 = arith.constant 0 : index
    %c0_6 = arith.constant 0 : index
    %6 = vector.load %arg4[%c0_5, %c0_6] : memref<16x32xf32, #tpu.memory_space<vmem>>, vector<16x32xf32>
    tpu.vector_store %arg4[%c0_5, %c0_6], %5 {strides = array<i32>} : memref<16x32xf32, #tpu.memory_space<vmem>>, vector<16x32xf32>,
    return
  }
  func.func @transform_0(%arg0: i32) -> (i32, i32) {
    %c0_i32 = arith.constant 0 : i32
    %c0_i32_0 = arith.constant 0 : i32
    return %arg0, %c0_i32 : i32, i32
  }
  func.func @transform_1(%arg0: i32) -> (i32, i32) {
    %c0_i32 = arith.constant 0 : i32
    %c0_i32_0 = arith.constant 0 : i32
    %c0_i32_1 = arith.constant 0 : i32
    return %c0_i32, %c0_i32_0 : i32, i32
  }
  func.func @transform_2(%arg0: i32) -> (i32, i32) {
    %c0_i32 = arith.constant 0 : i32
    %c0_i32_0 = arith.constant 0 : i32
    %c0_i32_1 = arith.constant 0 : i32
    return %c0_i32, %c0_i32_0 : i32, i32
  }
  func.func @transform_3(%arg0: i32) -> (i32, i32) {
    %c0_i32 = arith.constant 0 : i32
    %c0_i32_0 = arith.constant 0 : i32
    return %arg0, %c0_i32 : i32, i32
  }
}

</mosaic_0001>

<bundles_post_ra>
// kernel: tpu_custom_call.1
= control target key start
LH: loop header
LB: loop body
LE: loop exit
PB: predicated region body
PF: predicated region fallthrough
CT: control target
= control target key end

     0   :  { %6 = vsyncpa [#allocation3], 0  ;;  %s124_s0 = inlined_call_operand.hbm [shape: f32[8,128], index: 0, kind: input, shape index: {}]   ;;  %s125_s1 = inlined_call_operand.hbm [shape: f32[8,128], index: 1, kind: output, shape index: {}]  }
   0x1   :  { %7 = vsyncpa [#allocation4], 0  ;;  %s88_s6 = smov [#allocation2]   ;;  %s40_s10 = scalar_lea.hbm %s124_s0, 128 }
   0x2   :  { %s14_s7 = sshll.u32 %s88_s6, 4  ;;  %p41_p0 = scmp.ne.s32.totalorder %s124_s0, %s40_s10  ;;  %s15_s7 = int_to_ptr.vmem [resolvable:$true] %s14_s7 }
   0x3   :  { %p44_p1 = scmp.lt.u32.totalorder %s40_s10, %s124_s0 }
   0x5   :  { %p46_p2 = pnand %p44_p1, %p41_p0 }
   0x7   :  { %49 = shalt.err (!%p46_p2)
}
   0x8   :  { %s50_s15 = scalar_lea.vmem %s15_s7, 128  ;;  %p55_p4 = scmp.lt.s32.totalorder %s15_s7, %s15_s7 }
   0x9   :  { %p51_p3 = scmp.ne.s32.totalorder %s15_s7, %s50_s15  ;;  %p56_p5 = scmp.lt.s32.totalorder %s50_s15, %s50_s15 }
   0xb   :  { %p57_p6 = por %p56_p5, %p55_p4 }
   0xd   :  { %p58_p7 = pnand %p57_p6, %p51_p3 }
   0xf   :  { %61 = shalt.err (!%p58_p7)
}
  0x10   :  { %17 = dma.hbm_to_vmem [thread:$0]  %s124_s0, 128, %s15_s7, [#allocation3]  }
  0x11   :  { %84 = dma.done.wait [#allocation3], 128  }
  0x12   :  { %85 = vsyncadd [#allocation3], 4294967168  ;;  %s89_s18 = smov [#allocation5]   ;;  %v21_v0 = vld [vmem:[#allocation2] sm:$0xff] }
  0x13   :  { %s29_s19 = sshll.u32 %s89_s18, 4  ;;  %22 = vst [vmem:[#allocation5] sm:$0xff] %v21_v0  ;;  %s30_s19 = int_to_ptr.vmem [resolvable:$true] %s29_s19 }
  0x14   :  { %s62_s20 = scalar_lea.vmem %s30_s19, 128  ;;  %p67_p9 = scmp.lt.s32.totalorder %s30_s19, %s30_s19 }
  0x15   :  { %p63_p8 = scmp.ne.s32.totalorder %s30_s19, %s62_s20  ;;  %p68_p10 = scmp.lt.s32.totalorder %s62_s20, %s62_s20 }
  0x17   :  { %p69_p11 = por %p68_p10, %p67_p9 }
  0x19   :  { %p70_p12 = pnand %p69_p11, %p63_p8 }
  0x1b   :  { %73 = shalt.err (!%p70_p12)
}
  0x1c   :  { %s74_s23 = scalar_lea.hbm %s125_s1, 128 }
  0x1d   :  { %p75_p13 = scmp.ne.s32.totalorder %s125_s1, %s74_s23  ;;  %p78_p0 = scmp.lt.u32.totalorder %s74_s23, %s125_s1 }
  0x1f   :  { %p80_p1 = pnand %p78_p0, %p75_p13 }
  0x21   :  { %83 = shalt.err (!%p80_p1)
}
  0x22   :  { %32 = dma.vmem_to_hbm [thread:$0]  %s30_s19, 128, %s125_s1, [#allocation4]  }
  0x23   :  { %86 = dma.done.wait [#allocation4], 128  }
  0x24   :  { %87 = vsyncadd [#allocation4], 4294967168 }
  0x25   :  { %36 = vsyncpa [#allocation3], 1 }
  0x26   :  { %37 = vsyncpa [#allocation4], 1 }

// kernel: _patch_embed_impl.1
= control target key start
LH: loop header
LB: loop body
LE: loop exit
PB: predicated region body
PF: predicated region fallthrough
CT: control target
= control target key end

     0   :  { %8 = vsyncpa [#allocation3], 0  ;;  %s634_s0 = inlined_call_operand.vmem [shape: bf16[32,64], index: 0, kind: input, shape index: {}]   ;;  %s635_s1 = inlined_call_operand.vmem [shape: bf16[64,32], index: 1, kind: input, shape index: {}]   ;;  %s636_s2 = inlined_call_operand.vmem [shape: f32[1,32], index: 2, kind: input, shape index: {}]   ;;  %s637_s3 = inlined_call_operand.hbm [shape: f32[32,32], index: 3, kind: output, shape index: {}]  }
   0x1   :  { %10 = vsyncpa [#allocation3 + $0x1], 0  ;;  %s517_s12 = smov 0   ;;  %s519_s13 = smov 0  }
   0x2   :  { %s521_s14 = smov 0   ;;  %s523_s15 = smov 0  }
   0x3 LB: > { %s538_s16 = sadd.s32 4294967295, %s490_s15   ;;  %s343_s17 = sadd.s32 4294967294, %s490_s15   ;;  %s490_s15 = sphi %s523_s15, %s643_s15   ;;  %s486_s14 = sphi %s521_s14, %s642_s14   ;;  %s482_s13 = sphi %s519_s13, %s641_s13   ;;  %s478_s12 = sphi %s517_s12, %s640_s12  }
   0x4   : > { %s542_s18 = sadd.s32 1, %s490_s15   ;;  %s91_s19 = sadd.s32 1, %s486_s14 }
   0x5   : > { %s88_s20 = ssub.s32 %s490_s15, %s542_s18  ;;  %p101_p0 = scmp.ne.s32.totalorder %s486_s14, %s482_s13 }
   0x6   : > { %p89_p1 = scmp.eq.s32.totalorder %s88_s20, 0  ;;  %p102_p2 = scmp.eq.s32.totalorder %s538_s16, 1 }
   0x7   : > { %p107_p3 = scmp.ne.s32.totalorder %s482_s13, %s478_s12  ;;  %p108_p4 = scmp.eq.s32.totalorder %s343_s17, 1 }
   0x8   : > { %s553_s21 = scalar_select %p89_p1, %s486_s14, %s91_s19  }
   0x9   : > { %p555_p5 = por %p102_p2, %p101_p0  ;;  %p559_p6 = por %p108_p4, %p107_p3 }
   0xa   : > { %p346_p7 = scmp.ge.s32.totalorder %s490_s15, 1  ;;  %p141_p8 = scmp.lt.s32.totalorder %s490_s15, 3 }
   0xc   : > { %p142_p9 = pnand %p346_p7, %p141_p8 }
   0xd   : > { %v423_v0 = vld [vmem:[%s635_s1] sm:$0xff] (!%p142_p9)   ;;  %v492_v1 = vmov (!%p142_p9), 0.0   ;;  %v424_v2 = vld [vmem:[%s635_s1 + $0x8] sm:$0xff] (!%p142_p9)   ;;  %vm493_vm0 = vmmov (!%p142_p9), 0   ;;  %s348_s28 = sshll.u32 (!%p142_p9), %s538_s16, 1  ;;  %v425_v3 = vld [vmem:[%s635_s1 + $0x10] sm:$0xff] (!%p142_p9)  }
   0xe   : > { %145 = sbr.rel (%p142_p9) target bundleno = 261 (0x105), region = 32  ;;  %368 = vmatprep.subr.bf16.mxu0 (!%p142_p9), %v492_v1  ;;  %376 = vmatprep.mubr.msk.bf16.mxu0 (!%p142_p9), %vm493_vm0, %v492_v1  ;;  %p166_p10 = scmp.lt.s32.totalorder (!%p142_p9), %s348_s28, 3  ;;  %v426_v4 = vld [vmem:[%s635_s1 + $0x18] sm:$0xff] (!%p142_p9)   ;;  %vm219_vm1 = vcmask (!%p142_p9), 523264   ;;  %v350_v6 = vld [vmem:[%s636_s2] ss:$0 sm:$0xff] (!%p142_p9) }
   0xf   : > { %369 = vmatpush3.bf16.msra.mxu0 (!%p142_p9), %v423_v0  ;;  %s162_s10 = sand.u32 (!%p142_p9), 1, %s482_s13   ;;  %s362_s25 = sshll.u32 (!%p142_p9), %s538_s16, 8  ;;  %vm264_vm2 = vcmask (!%p142_p9), 261120  }
  0x10   : > { %370 = vmatprep.subr.bf16.mxu0 (!%p142_p9), %v492_v1  ;;  %s347_s11 = sshll.u32 (!%p142_p9), %s162_s10, 4  ;;  %s593_s16 = scalar_lea.sflag (!%p142_p9), [#allocation3], %s162_s10 }
  0x11   : > { %s164_s20 = scalar_lea.vmem (!%p142_p9), [#allocation2], %s347_s11  ;;  %s494_s30 = smov (!%p142_p9), [#allocation2]  }
  0x12   : > { %s281_s24 = sshll.u32 (!%p142_p9), %s164_s20, 4  ;;  %s586_s24 = int_to_ptr.vmem [resolvable:$true] %s281_s24 }
  0x13   : > { %371 = vmatpush3.bf16.msra.mxu0 (!%p142_p9), %v424_v2  ;;  %s428_s29 = scalar_lea.vmem (!%p142_p9), %s586_s24, 256 }
  0x14   : > { %372 = vmatprep.subr.bf16.mxu0 (!%p142_p9), %v492_v1  ;;  %p429_p11 = scmp.ne.s32.totalorder (!%p142_p9), %s586_s24, %s428_s29 }
  0x15   : > { %s645_s28 = smov (!%p166_p10, %s348_s28), 3 }
  0x16   : > { %s349_s4 = sshll.u32 %s645_s28, 2  ;;  %s591_s28 = scalar_lea.hbm %s637_s3, %s362_s25 }
  0x17   : > { %s169_s7 = scalar_lea.vmem %s634_s0, %s349_s4  ;;  %373 = vmatpush3.bf16.msra.mxu0 %v425_v3  ;;  %p430_p12 = pnand %p429_p11, %p555_p5 }
  0x18   : > { %374 = vmatprep.subr.bf16.mxu0 %v492_v1  ;;  %v427_v5 = vld [vmem:[%s169_s7] sm:$0xff]   ;;  %s432_s4 = sshll.u32 %s494_s30, 4  ;;  %s433_s4 = int_to_ptr.vmem [resolvable:$false] %s432_s4 }
  0x19   : > { %p431_p13 = pneg %p430_p12  ;;  %s434_s5 = scalar_lea.vmem %s433_s4, 512 }
  0x1a   : > { %p435_p0 = scmp.lt.s32.totalorder %s586_s24, %s433_s4  ;;  %p436_p1 = scmp.lt.s32.totalorder %s434_s5, %s428_s29 }
  0x1b   : > { %375 = vmatpush3.bf16.msra.mxu0 %v426_v4 }
  0x1c   : > { %p437_p2 = por %p436_p1, %p435_p0 }
  0x1e   : > { %377 = vmatmul.mubr.msk.bf16.vlgmr.msra.gmra.mrb[0].mxu0 %vm219_vm1, %v427_v5  ;;  %p438_p3 = pnand %p437_p2, %p431_p13 }
  0xf1   : > { %v257_v7 = vpop.f32.mrb[0].mxu0 }
  0xf2   : > { %v258_v8 = vadd.f32 %v350_v6, %v257_v7  ;;  %v378_v9 = vpop.f32.mrb[1].mxu0 }
  0xf3   : > { %v260_v10 = vpop.f32.mrb[2].mxu0 }
  0xf4   : > { %265 = vst.msk [vmem:[%s164_s20] sm:$0xff] %vm264_vm2, %v258_v8  ;;  %v261_v11 = vadd.f32 %v350_v6, %v260_v10  ;;  %v379_v12 = vpop.f32.mrb[3].mxu0 }
  0xf6   : > { %266 = vst.msk [vmem:[%s164_s20 + $0x8] sm:$0xff] %vm264_vm2, %v261_v11 }
  0xf7   : > { %441 = shalt.err (!%p438_p3)
}
  0xf8   : > { %s442_s6 = scalar_lea.hbm %s591_s28, 256  ;;  %s446_s9 = scalar_lea.hbm %s637_s3, 512 }
  0xf9   : > { %p443_p4 = scmp.ne.s32.totalorder %s591_s28, %s442_s6  ;;  %p447_p9 = scmp.lt.u32.totalorder %s591_s28, %s637_s3 }
  0xfa   : > { %p448_p10 = scmp.lt.u32.totalorder %s446_s9, %s442_s6  ;;  %p450_p12 = scmp.lt.u32.totalorder %s442_s6, %s591_s28 }
  0xfb   : > { %p444_p7 = pnand %p443_p4, %p555_p5 }
  0xfc   : > { %p449_p11 = por %p448_p10, %p447_p9 }
  0xfd   : > { %p445_p8 = pneg %p444_p7 }
  0xfe   : > { %p451_p13 = por %p450_p12, %p449_p11 }
 0x100   : > { %p452_p0 = pnand %p451_p13, %p445_p8 }
 0x102   : > { %455 = shalt.err (!%p452_p0)
}
 0x103   : > { %s495_s17 = smov 128   ;;  %s496_s19 = smov 8  }
 0x104   : > { %380 = dma.vmem_to_hbm [thread:$0]  (%p555_p5), %s586_s24, 256, %s591_s28, %s593_s16, %s495_s17, %s495_s17, %s496_s19  }
 0x105 PF: > { %p386_p1 = scmp.ge.s32.totalorder %s490_s15, 2  ;;  %s296_s20 = sand.u32 1, %s478_s12  }
 0x106   : > { %s297_s25 = scalar_lea.sflag [#allocation3], %s296_s20 }
 0x107   : > { %p383_p2 = pnand %p386_p1, %p559_p6 }
 0x109   : > { %473 = dma.done.wait (!%p383_p2), %s297_s25, 256  }
 0x10a   : > { %475 = vsyncadd (!%p383_p2), %s297_s25, 4294967040  ;;  %p13_p3 = scmp.ge.s32.totalorder %s542_s18, 4   ;;  %s640_s12 = smov %s482_s13 }
 0x10b   : > { %s641_s13 = smov %s486_s14  ;;  %s642_s14 = smov %s553_s21 }
 0x10c   : > { %s643_s15 = smov %s542_s18  ;;  %15 = sbr.rel (!%p13_p3) target bundleno = 3 (0x3), region = 67 }
 0x113   :  { %302 = vsyncpa [#allocation3], 1 }
 0x114   :  { %304 = vsyncpa [#allocation3 + $0x1], 1 }

</bundles_post_ra>
